<compile_context>
chip_gen: v7x
topology: tpu7x:2x2x1
jax: 0.10.0
libtpu: 0.0.40
codegen_flags: <defaults>
</compile_context>

<pallas_src>
import jax
import jax.numpy as jnp
from jax.experimental import pallas as pl
from jax.experimental.pallas import tpu as pltpu


def _round_up(x, m):
    return (x + m - 1) // m * m


def fused_gcn_kernel(a_hbm, h0_hbm, invdeg_ref, w_ref, b_ref, o_ref,
                     a_buf, h_buf):
    """One grid step == one GraphConv layer.

    A and h0 live in HBM (memory_space=pl.ANY) and are DMA'd once into
    single-copy VMEM scratch at layer 0; the running h is carried in VMEM
    scratch across layers; per-layer W/b are streamed (double-buffered) by the
    BlockSpec pipeline.
    """
    layer = pl.program_id(0)
    last = pl.num_programs(0) - 1

    @pl.when(layer == 0)
    def _():
        pltpu.sync_copy(a_hbm, a_buf)    # adjacency: exactly one HBM->VMEM DMA
        pltpu.sync_copy(h0_hbm, h_buf)   # h0 = x @ W0 (projection done in XLA)

    # Neighbor aggregation on the MXU (f32 accumulation) + 'right' norm with
    # the precomputed 1/in-degree.
    agg = jnp.dot(a_buf[...], h_buf[...], preferred_element_type=jnp.float32)
    agg = agg * invdeg_ref[...]

    # Feature transform.  w_ref[0] is the identity for layer 0 (W0 was folded
    # into h0 at its own, narrower padding in the wrapper).
    out = jnp.dot(agg.astype(jnp.bfloat16), w_ref[0],
                  preferred_element_type=jnp.float32) + b_ref[0]

    @pl.when(layer < last)
    def _():
        # Hidden layers: ReLU + downcast in one pass into the running-h scratch.
        h_buf[...] = jnp.maximum(out, 0.0).astype(h_buf.dtype)

    @pl.when(layer == last)
    def _():
        # Output layer: no activation; single HBM writeback (constant index map).
        o_ref[...] = out.astype(o_ref.dtype)


def gcn_dropedge_forward(adj, features, weights, biases,
                         norm_type="right", norm_bias=0.0):
    """Forward pass of GCNDropEdge (eval mode, sample_rate=1.0), fully fused.

    adj:      [N, N] dense 0/1 adjacency (self-loops added by the caller)
    features: [N, in_feats]
    weights:  list of [fan_in, fan_out] GraphConv weights (in layer order)
    biases:   list of [1, fan_out] GraphConv biases
    """
    assert norm_type == "right"
    n = adj.shape[0]
    n_classes = weights[-1].shape[1]
    num_layers = len(weights)

    # Fused-loop width: only hidden/classes widths (input projection handled
    # separately below), per perf feedback.
    f_pad = _round_up(max(w.shape[1] for w in weights), 128)
    n_pad = _round_up(n, 128)

    # 1/in-degree once (A never changes across layers); guard isolated nodes.
    deg = jnp.sum(adj.astype(jnp.float32), axis=1, keepdims=True) + norm_bias
    inv_deg = jnp.where(deg > 0, 1.0 / jnp.where(deg > 0, deg, 1.0), 0.0)
    inv_deg = jnp.pad(inv_deg, ((0, n_pad - n), (0, 0))).astype(jnp.float32)

    # A is exactly 0/1 -> bf16 is lossless.
    a = jnp.pad(adj, ((0, n_pad - n), (0, n_pad - n))).astype(jnp.bfloat16)

    # Input projection at its own padding.  With norm='right':
    #   D^-1 (A x) W0 == D^-1 A (x W0),
    # so the fused loop never sees the in_feats width.
    z0 = jnp.dot(features.astype(jnp.float32), weights[0].astype(jnp.float32))
    h0 = jnp.pad(z0, ((0, n_pad - n),
                      (0, f_pad - z0.shape[1]))).astype(jnp.bfloat16)

    # Per-layer weights streamed by the pipeline; slot 0 is the identity since
    # W0 is already folded into h0.
    w_stack = [jnp.eye(f_pad, dtype=jnp.float32)]
    for w in weights[1:]:
        w_stack.append(jnp.pad(w.astype(jnp.float32),
                               ((0, f_pad - w.shape[0]),
                                (0, f_pad - w.shape[1]))))
    w_all = jnp.stack(w_stack).astype(jnp.bfloat16)                  # [L, Fp, Fp]
    b_all = jnp.stack(
        [jnp.pad(b.astype(jnp.float32), ((0, 0), (0, f_pad - b.shape[1])))
         for b in biases])                                           # [L, 1, Fp]

    # ---- VMEM budget: single-copy residents + double-buffered streams ------
    resident = (n_pad * n_pad * 2            # A scratch (single VMEM copy)
                + n_pad * f_pad * 2          # running-h scratch
                + 2 * n_pad * f_pad * 4      # f32 output block (x2, conservative)
                + 2 * n_pad * 4)             # 1/deg block (x2)
    streamed = 2 * (f_pad * f_pad * 2 + f_pad * 4)   # W_l / b_l double-buffered
    temporaries = 2 * n_pad * f_pad * 4              # live f32 agg/out tiles
    need = resident + streamed + temporaries + (4 << 20)   # compiler headroom
    try:
        vmem_cap = pltpu.get_tpu_info().vmem_capacity_bytes
    except Exception:
        vmem_cap = 64 * 1024 * 1024          # conservative (v7x per-core VMEM)
    budget = int(vmem_cap * 0.9)
    if need > budget:
        raise NotImplementedError(
            f"VMEM-resident path needs ~{need >> 20} MiB, budget {budget >> 20} "
            "MiB; row-tiled fallback not implemented (see TODO).")
    vmem_bytes = int(min(budget, max(need, 16 * 1024 * 1024)))

    flops = num_layers * (2 * n_pad * n_pad * f_pad + 2 * n_pad * f_pad * f_pad)
    bytes_accessed = (a.size * 2 + h0.size * 2 + inv_deg.size * 4
                      + w_all.size * 2 + b_all.size * 4 + n_pad * f_pad * 4)

    out_padded = pl.pallas_call(
        fused_gcn_kernel,
        out_shape=jax.ShapeDtypeStruct((n_pad, f_pad), jnp.float32),
        grid_spec=pltpu.PrefetchScalarGridSpec(
            num_scalar_prefetch=0,
            grid=(num_layers,),
            in_specs=[
                pl.BlockSpec(memory_space=pl.ANY),                     # A (HBM, copied once)
                pl.BlockSpec(memory_space=pl.ANY),                     # h0 (HBM, copied once)
                pl.BlockSpec((n_pad, 1), lambda l: (0, 0)),            # 1/deg
                pl.BlockSpec((1, f_pad, f_pad), lambda l: (l, 0, 0)),  # W_l (streamed)
                pl.BlockSpec((1, 1, f_pad), lambda l: (l, 0, 0)),      # b_l (streamed)
            ],
            out_specs=pl.BlockSpec((n_pad, f_pad), lambda l: (0, 0)),
            scratch_shapes=[
                pltpu.VMEM((n_pad, n_pad), jnp.bfloat16),   # A (single copy)
                pltpu.VMEM((n_pad, f_pad), jnp.bfloat16),   # running h
            ],
        ),
        compiler_params=pltpu.CompilerParams(
            dimension_semantics=("arbitrary",),   # layers are sequential
            vmem_limit_bytes=vmem_bytes,
        ),
        cost_estimate=pl.CostEstimate(
            flops=int(flops), transcendentals=0,
            bytes_accessed=int(bytes_accessed)),
    )(a, h0, inv_deg, w_all, b_all)

    return out_padded[:n, :n_classes]


def init_params(key, in_feats, n_hidden, n_classes, n_layers):
    """Glorot-uniform weights for the GraphConv stack:
    GraphConv(in,hid) + (n_layers-1) x GraphConv(hid,hid) + GraphConv(hid,cls).
    Biases are small random values (DGL default is zeros) purely so the test
    exercises the bias path."""
    dims = [in_feats] + [n_hidden] * n_layers + [n_classes]
    keys = jax.random.split(key, 2 * (len(dims) - 1))
    weights, biases = [], []
    for i in range(len(dims) - 1):
        fan_in, fan_out = dims[i], dims[i + 1]
        limit = jnp.sqrt(6.0 / (fan_in + fan_out))
        weights.append(jax.random.uniform(
            keys[2 * i], (fan_in, fan_out), minval=-limit, maxval=limit,
            dtype=jnp.float32))
        biases.append(0.1 * jax.random.normal(
            keys[2 * i + 1], (1, fan_out), dtype=jnp.float32))
    return weights, biases


def gcn_reference(adj, features, weights, biases, norm_bias=0.0):
    """Pure-JAX f32 reference of the same forward pass (eval mode)."""
    deg = jnp.sum(adj, axis=1, keepdims=True) + norm_bias
    inv = jnp.where(deg > 0, 1.0 / jnp.where(deg > 0, deg, 1.0), 0.0)
    h = features
    for i, (w, b) in enumerate(zip(weights, biases)):
        h = (adj @ h) * inv
        h = h @ w + b
        if i < len(weights) - 1:
            h = jnp.maximum(h, 0.0)
    return h


if __name__ == "__main__":
    # Small synthetic graph: N nodes, random sparse edges + self-loops.
    N, in_feats, n_hidden, n_classes, n_layers = 128, 32, 64, 8, 2

    key = jax.random.PRNGKey(0)
    k_adj, k_feat, k_param = jax.random.split(key, 3)

    adj = (jax.random.uniform(k_adj, (N, N)) < 0.05).astype(jnp.float32)
    adj = jnp.maximum(adj, jnp.eye(N, dtype=jnp.float32))   # add self-loops

    features = jax.random.normal(k_feat, (N, in_feats), dtype=jnp.float32)
    weights, biases = init_params(k_param, in_feats, n_hidden, n_classes,
                                  n_layers)

    out = gcn_dropedge_forward(adj, features, weights, biases,
                               norm_type="right", norm_bias=0.0)
    out = jax.block_until_ready(out)
    assert out.shape == (N, n_classes)

    ref = gcn_reference(adj, features, weights, biases)
    err = float(jnp.max(jnp.abs(out - ref)))
    assert err < 1e-1, f"kernel/reference mismatch: max abs err {err}"
    print("KERNEL_OK")
</pallas_src>

<mosaic_0001>
module attributes {stable_mosaic.version = 11 : i64} {
  func.func @fused_gcn_kernel(%arg0: i32, %arg1: memref<128x128xbf16, #tpu.memory_space<any>>, %arg2: memref<128x128xbf16, #tpu.memory_space<any>>, %arg3: memref<128x1xf32, #tpu.memory_space<vmem>>, %arg4: memref<1x128x128xbf16, #tpu.memory_space<vmem>>, %arg5: memref<1x1x128xf32, #tpu.memory_space<vmem>>, %arg6: memref<128x128xf32, #tpu.memory_space<vmem>>, %arg7: memref<128x128xbf16, #tpu.memory_space<vmem>>, %arg8: memref<128x128xbf16, #tpu.memory_space<vmem>>) attributes {dimension_semantics = [#tpu.dimension_semantics<arbitrary>], iteration_bounds = array<i64: 3>, scalar_prefetch = 0 : i64, scratch_operands = 2 : i64, tpu.core_type = #tpu.core_type<tc>, window_params = [{}, {}, {pipeline_mode = #tpu.pipeline_mode<synchronous>, transform_indices = @transform_2, window_bounds = array<i64: 128, 1>}, {transform_indices = @transform_3, window_bounds = array<i64: 1, 128, 128>}, {transform_indices = @transform_4, window_bounds = array<i64: 1, 1, 128>}, {pipeline_mode = #tpu.pipeline_mode<synchronous>, transform_indices = @transform_5, window_bounds = array<i64: 128, 128>}]} {
    %c0_i32 = arith.constant 0 : i32
    %0 = arith.cmpi eq, %arg0, %c0_i32 : i32
    %1 = arith.extui %0 : i1 to i32
    %c0_i32_0 = arith.constant 0 : i32
    %2 = arith.cmpi ne, %1, %c0_i32_0 : i32
    scf.if %2 {
      "tpu.region"() ({
        %23 = tpu.sem_alloc : memref<!tpu.dma_semaphore, #tpu.memory_space<semaphore_mem>>
        tpu.enqueue_dma source(%arg1 : memref<128x128xbf16, #tpu.memory_space<any>>) target(%arg7 : memref<128x128xbf16, #tpu.memory_space<vmem>>) target_semaphore(%23 : memref<!tpu.dma_semaphore, #tpu.memory_space<semaphore_mem>>)
        tpu.wait_dma2 semaphore(%23 : memref<!tpu.dma_semaphore, #tpu.memory_space<semaphore_mem>>) src(%arg1 : memref<128x128xbf16, #tpu.memory_space<any>>) dst(%arg7 : memref<128x128xbf16, #tpu.memory_space<vmem>>)
        tpu.yield
      }) : () -> ()
      "tpu.region"() ({
        %23 = tpu.sem_alloc : memref<!tpu.dma_semaphore, #tpu.memory_space<semaphore_mem>>
        tpu.enqueue_dma source(%arg2 : memref<128x128xbf16, #tpu.memory_space<any>>) target(%arg8 : memref<128x128xbf16, #tpu.memory_space<vmem>>) target_semaphore(%23 : memref<!tpu.dma_semaphore, #tpu.memory_space<semaphore_mem>>)
        tpu.wait_dma2 semaphore(%23 : memref<!tpu.dma_semaphore, #tpu.memory_space<semaphore_mem>>) src(%arg2 : memref<128x128xbf16, #tpu.memory_space<any>>) dst(%arg8 : memref<128x128xbf16, #tpu.memory_space<vmem>>)
        tpu.yield
      }) : () -> ()
    } else {
    }
    %c0 = arith.constant 0 : index
    %c0_1 = arith.constant 0 : index
    %3 = vector.load %arg7[%c0, %c0_1] : memref<128x128xbf16, #tpu.memory_space<vmem>>, vector<128x128xbf16>
    %c0_2 = arith.constant 0 : index
    %c0_3 = arith.constant 0 : index
    %4 = vector.load %arg8[%c0_2, %c0_3] : memref<128x128xbf16, #tpu.memory_space<vmem>>, vector<128x128xbf16>
    %cst = arith.constant dense<0.000000e+00> : vector<128x128xf32>
    %5 = tpu.matmul %3, %4, %cst {dimension_numbers = #tpu.dot_dimension_numbers<[1], [0], [0], [1], [0, 0, 1, 1], [], []>} : vector<128x128xbf16>, vector<128x128xbf16>, vector<128x128xf32> -> vector<128x128xf32>
    %c0_4 = arith.constant 0 : index
    %c0_5 = arith.constant 0 : index
    %6 = vector.load %arg3[%c0_4, %c0_5] : memref<128x1xf32, #tpu.memory_space<vmem>>, vector<128x1xf32>
    %7 = vector.broadcast %6 : vector<128x1xf32> to vector<128x128xf32>
    %8 = arith.mulf %5, %7 : vector<128x128xf32>
    %9 = arith.truncf %8 : vector<128x128xf32> to vector<128x128xbf16>
    %c0_6 = arith.constant 0 : index
    %c0_7 = arith.constant 0 : index
    %c0_8 = arith.constant 0 : index
    %10 = vector.load %arg4[%c0_6, %c0_7, %c0_8] : memref<1x128x128xbf16, #tpu.memory_space<vmem>>, vector<1x128x128xbf16>
    %11 = vector.shape_cast %10 : vector<1x128x128xbf16> to vector<128x128xbf16>
    %cst_9 = arith.constant dense<0.000000e+00> : vector<128x128xf32>
    %12 = tpu.matmul %9, %11, %cst_9 {dimension_numbers = #tpu.dot_dimension_numbers<[1], [0], [0], [1], [0, 0, 1, 1], [], []>} : vector<128x128xbf16>, vector<128x128xbf16>, vector<128x128xf32> -> vector<128x128xf32>
    %c0_10 = arith.constant 0 : index
    %c0_11 = arith.constant 0 : index
    %c0_12 = arith.constant 0 : index
    %13 = vector.load %arg5[%c0_10, %c0_11, %c0_12] : memref<1x1x128xf32, #tpu.memory_space<vmem>>, vector<1x1x128xf32>
    %14 = vector.shape_cast %13 : vector<1x1x128xf32> to vector<1x128xf32>
    %15 = vector.broadcast %14 : vector<1x128xf32> to vector<128x128xf32>
    %16 = arith.addf %12, %15 : vector<128x128xf32>
    %c2_i32 = arith.constant 2 : i32
    %17 = arith.cmpi slt, %arg0, %c2_i32 : i32
    %18 = arith.extui %17 : i1 to i32
    %c0_i32_13 = arith.constant 0 : i32
    %19 = arith.cmpi ne, %18, %c0_i32_13 : i32
    scf.if %19 {
      %cst_16 = arith.constant 0.000000e+00 : f32
      %23 = vector.broadcast %cst_16 : f32 to vector<128x128xf32>
      %24 = arith.maximumf %16, %23 : vector<128x128xf32>
      %25 = arith.truncf %24 : vector<128x128xf32> to vector<128x128xbf16>
      %c0_17 = arith.constant 0 : index
      %c0_18 = arith.constant 0 : index
      %26 = vector.load %arg8[%c0_17, %c0_18] : memref<128x128xbf16, #tpu.memory_space<vmem>>, vector<128x128xbf16>
      tpu.vector_store %arg8[%c0_17, %c0_18], %25 {strides = array<i32>} : memref<128x128xbf16, #tpu.memory_space<vmem>>, vector<128x128xbf16>,
    } else {
    }
    %c2_i32_14 = arith.constant 2 : i32
    %20 = arith.cmpi eq, %arg0, %c2_i32_14 : i32
    %21 = arith.extui %20 : i1 to i32
    %c0_i32_15 = arith.constant 0 : i32
    %22 = arith.cmpi ne, %21, %c0_i32_15 : i32
    scf.if %22 {
      %c0_16 = arith.constant 0 : index
      %c0_17 = arith.constant 0 : index
      %23 = vector.load %arg6[%c0_16, %c0_17] : memref<128x128xf32, #tpu.memory_space<vmem>>, vector<128x128xf32>
      tpu.vector_store %arg6[%c0_16, %c0_17], %16 {strides = array<i32>} : memref<128x128xf32, #tpu.memory_space<vmem>>, vector<128x128xf32>,
    } else {
    }
    return
  }
  func.func @transform_2(%arg0: i32) -> (i32, i32) {
    %c0_i32 = arith.constant 0 : i32
    %c0_i32_0 = arith.constant 0 : i32
    %c0_i32_1 = arith.constant 0 : i32
    return %c0_i32, %c0_i32_0 : i32, i32
  }
  func.func @transform_3(%arg0: i32) -> (i32, i32, i32) {
    %c0_i32 = arith.constant 0 : i32
    %c0_i32_0 = arith.constant 0 : i32
    %c0_i32_1 = arith.constant 0 : i32
    return %arg0, %c0_i32, %c0_i32_0 : i32, i32, i32
  }
  func.func @transform_4(%arg0: i32) -> (i32, i32, i32) {
    %c0_i32 = arith.constant 0 : i32
    %c0_i32_0 = arith.constant 0 : i32
    %c0_i32_1 = arith.constant 0 : i32
    return %arg0, %c0_i32, %c0_i32_0 : i32, i32, i32
  }
  func.func @transform_5(%arg0: i32) -> (i32, i32) {
    %c0_i32 = arith.constant 0 : i32
    %c0_i32_0 = arith.constant 0 : i32
    %c0_i32_1 = arith.constant 0 : i32
    return %c0_i32, %c0_i32_0 : i32, i32
  }
}

</mosaic_0001>

<bundles_post_ra>
// kernel: tpu_custom_call.1
= control target key start
LH: loop header
LB: loop body
LE: loop exit
PB: predicated region body
PF: predicated region fallthrough
CT: control target
= control target key end

     0   :  { %10 = vsyncpa [#allocation5], 0  ;;  %s1442_s0 = inlined_call_operand.vmem [shape: bf16[128,128], index: 0, kind: input, shape index: {}]   ;;  %s1443_s1 = inlined_call_operand.vmem [shape: bf16[128,128], index: 1, kind: input, shape index: {}]   ;;  %s1444_s2 = inlined_call_operand.vmem [shape: f32[128,1], index: 2, kind: input, shape index: {}]   ;;  %s1445_s3 = inlined_call_operand.hbm [shape: bf16[3,128,128], index: 3, kind: input, shape index: {}]   ;;  %s1446_s4 = inlined_call_operand.vmem [shape: f32[3,1,128], index: 4, kind: input, shape index: {}]   ;;  %s1447_s5 = inlined_call_operand.hbm [shape: f32[128,128], index: 5, kind: output, shape index: {}]  }
   0x1   :  { %12 = vsyncpa [#allocation5 + $0x1], 0 }
   0x2   :  { %13 = vsyncpa [#allocation6], 0  ;;  %s1178_s18 = smov 0   ;;  %s1180_s19 = smov 0  }
   0x3   :  { %s1182_s20 = smov 0   ;;  %s1184_s21 = smov 0  }
   0x4 LB: > { %s1197_s22 = sadd.s32 4294967295, %s1139_s21   ;;  %s1200_s23 = sadd.s32 1, %s1139_s21   ;;  %s1139_s21 = sphi %s1184_s21, %s1454_s21   ;;  %s1135_s20 = sphi %s1182_s20, %s1453_s20   ;;  %s1131_s19 = sphi %s1180_s19, %s1452_s19   ;;  %s1127_s18 = sphi %s1178_s18, %s1451_s18  }
   0x5   : > { %s44_s24 = ssub.s32 %s1139_s21, %s1200_s23  ;;  %s47_s25 = sadd.s32 1, %s1135_s20 }
   0x6   : > { %p45_p0 = scmp.eq.s32.totalorder %s44_s24, 0  ;;  %p54_p1 = scmp.ne.s32.totalorder %s1135_s20, %s1131_s19 }
   0x7   : > { %p55_p2 = scmp.eq.s32.totalorder %s1139_s21, 0  ;;  %p60_p3 = scmp.ne.s32.totalorder %s1131_s19, %s1127_s18 }
   0x8   : > { %s1210_s26 = scalar_select %p45_p0, %s1135_s20, %s47_s25  }
   0x9   : > { %p56_p4 = por %p55_p2, %p54_p1  ;;  %p61_p5 = scmp.eq.s32.totalorder %s1197_s22, 0 }
   0xa   : > { %p990_p6 = scmp.lt.s32.totalorder %s1139_s21, 3  ;;  %s134_s28 = sand.u32 1, %s1135_s20  }
   0xb   : > { %p1214_p7 = por %p61_p5, %p60_p3  ;;  %s862_s29 = sshll.u32 %s134_s28, 6 }
   0xc   : > { %s883_s30 = sshll.u32 %s1139_s21, 10  ;;  %s138_s9 = scalar_lea.vmem [#allocation4], %s862_s29 }
   0xd   : > { %s1223_s8 = scalar_lea.hbm %s1445_s3, %s883_s30  ;;  %s145_s10 = sshll.u32 %s138_s9, 4  ;;  %s1225_s10 = int_to_ptr.vmem [resolvable:$true] %s145_s10 }
   0xe   : > { %p1227_p8 = pnand %p990_p6, %p56_p4  ;;  %s1232_s12 = scalar_lea.sflag [#allocation5], %s134_s28 }
   0xf   : > { %s1041_s13 = scalar_lea.hbm %s1223_s8, 1024  ;;  %s1046_s16 = scalar_lea.hbm %s1445_s3, 3072 }
  0x10   : > { %p1042_p10 = scmp.ne.s32.totalorder %s1223_s8, %s1041_s13  ;;  %p1043_p11 = pneg %p1227_p8 }
  0x11   : > { %p1047_p0 = scmp.lt.u32.totalorder %s1223_s8, %s1445_s3  ;;  %p1048_p1 = scmp.lt.u32.totalorder %s1046_s16, %s1041_s13 }
  0x12   : > { %p1044_p12 = pnand %p1043_p11, %p1042_p10  ;;  %p1050_p3 = scmp.lt.u32.totalorder %s1041_s13, %s1223_s8 }
  0x13   : > { %p1049_p2 = por %p1048_p1, %p1047_p0 }
  0x14   : > { %p1045_p13 = pneg %p1044_p12 }
  0x15   : > { %p1051_p4 = por %p1050_p3, %p1049_p2 }
  0x17   : > { %p1052_p5 = pnand %p1051_p4, %p1045_p13 }
  0x19   : > { %1055 = shalt.err (!%p1052_p5)
}
  0x1a   : > { %s1056_s24 = scalar_lea.vmem %s1225_s10, 1024  ;;  %s1141_s25 = smov [#allocation4]  }
  0x1b   : > { %p1057_p6 = scmp.ne.s32.totalorder %s1225_s10, %s1056_s24  ;;  %s1061_s28 = sshll.u32 %s1141_s25, 4  ;;  %s1062_s28 = int_to_ptr.vmem [resolvable:$false] %s1061_s28 }
  0x1c   : > { %s1063_s29 = scalar_lea.vmem %s1062_s28, 2048  ;;  %p1064_p9 = scmp.lt.s32.totalorder %s1225_s10, %s1062_s28 }
  0x1d   : > { %p1059_p10 = pnand %p1057_p6, %p1043_p11  ;;  %p1065_p0 = scmp.lt.s32.totalorder %s1063_s29, %s1056_s24 }
  0x1f   : > { %p1060_p12 = pneg %p1059_p10  ;;  %p1066_p1 = por %p1065_p0, %p1064_p9 }
  0x21   : > { %p1067_p2 = pnand %p1066_p1, %p1060_p12 }
  0x23   : > { %1070 = shalt.err (!%p1067_p2)
}
  0x24   : > { %s1142_s30 = smov 64   ;;  %s1143_s6 = smov 4  }
  0x25   : > { %989 = dma.hbm_to_vmem [thread:$0]  (!%p1227_p8), %s1223_s8, 1024, %s1225_s10, %s1232_s12, %s1142_s30, %s1142_s30, %s1143_s6  }
  0x26   : > { %p159_p11 = scmp.lt.s32.totalorder %s1139_s21, 4  ;;  %p1450_p13 = scmp.ge.s32.totalorder %s1139_s21, 1 }
  0x28   : > { %p160_p3 = pnand %p1450_p13, %p159_p11 }
  0x29   : > { %s165_s7 = sand.u32 (!%p160_p3), 1, %s1131_s19  }
  0x2a   : > { %163 = sbr.rel (%p160_p3) target bundleno = 610 (0x262), region = 32  ;;  %s866_s9 = sshll.u32 (!%p160_p3), %s165_s7, 6 }
  0x2b   : > { %s166_s13 = scalar_lea.sflag (!%p160_p3), [#allocation5], %s165_s7  ;;  %s1264_s14 = scalar_lea.vmem (!%p160_p3), [#allocation4], %s866_s9 }
  0x31   : > { %1114 = dma.done.wait (%p1214_p7), %s166_s13, 1024  }
  0x32   : > { %1116 = vsyncadd (%p1214_p7), %s166_s13, 4294966272  ;;  %p190_p9 = scmp.lt.s32.totalorder %s1197_s22, 2  ;;  %p867_p8 = scmp.ne.s32.totalorder %s1197_s22, 0 }
  0x34   : > { %s1272_s8 = scalar_select %p190_p9, %s1197_s22, 2 }
  0x35   : > { %197 = sbr.rel (%p867_p8) target bundleno = 76 (0x4c), region = 40 }
  0x36   : > { %s192_s11 = scalar_lea.vmem %s1446_s4, %s1272_s8 }
  0x3c   : > { %v230_v0 = vld [vmem:[%s1442_s0] sm:$0xff]  ;;  %v232_v1 = vld [vmem:[%s1442_s0 + $0x8] sm:$0xff]  ;;  %v234_v2 = vld [vmem:[%s1442_s0 + $0x10] sm:$0xff] }
  0x3d   : > { %231 = vst [vmem:[#allocation2] sm:$0xff] %v230_v0  ;;  %233 = vst [vmem:[#allocation2 + $0x8] sm:$0xff] %v232_v1  ;;  %v236_v3 = vld [vmem:[%s1442_s0 + $0x18] sm:$0xff]  ;;  %v238_v4 = vld [vmem:[%s1442_s0 + $0x20] sm:$0xff] }
  0x3e   : > { %235 = vst [vmem:[#allocation2 + $0x10] sm:$0xff] %v234_v2  ;;  %v240_v5 = vld [vmem:[%s1442_s0 + $0x28] sm:$0xff]  ;;  %237 = vst [vmem:[#allocation2 + $0x18] sm:$0xff] %v236_v3  ;;  %v242_v6 = vld [vmem:[%s1442_s0 + $0x30] sm:$0xff] }
  0x3f   : > { %239 = vst [vmem:[#allocation2 + $0x20] sm:$0xff] %v238_v4  ;;  %241 = vst [vmem:[#allocation2 + $0x28] sm:$0xff] %v240_v5  ;;  %v244_v7 = vld [vmem:[%s1442_s0 + $0x38] sm:$0xff] }
  0x40   : > { %243 = vst [vmem:[#allocation2 + $0x30] sm:$0xff] %v242_v6  ;;  %245 = vst [vmem:[#allocation2 + $0x38] sm:$0xff] %v244_v7 }
  0x41   : > { %253 = vsyncadd [#allocation8], 1024 }
  0x42   : > { %1117 = dma.done.wait [#allocation8], 1024 }
  0x43   : > { %1118 = vsyncadd [#allocation8], 4294966272 }
  0x44   : > { %v290_v8 = vld [vmem:[%s1443_s1] sm:$0xff]  ;;  %v292_v9 = vld [vmem:[%s1443_s1 + $0x8] sm:$0xff]  ;;  %v294_v10 = vld [vmem:[%s1443_s1 + $0x10] sm:$0xff] }
  0x45   : > { %291 = vst [vmem:[#allocation3] sm:$0xff] %v290_v8  ;;  %293 = vst [vmem:[#allocation3 + $0x8] sm:$0xff] %v292_v9  ;;  %v296_v11 = vld [vmem:[%s1443_s1 + $0x18] sm:$0xff]  ;;  %v298_v12 = vld [vmem:[%s1443_s1 + $0x20] sm:$0xff] }
  0x46   : > { %295 = vst [vmem:[#allocation3 + $0x10] sm:$0xff] %v294_v10  ;;  %v300_v13 = vld [vmem:[%s1443_s1 + $0x28] sm:$0xff]  ;;  %297 = vst [vmem:[#allocation3 + $0x18] sm:$0xff] %v296_v11  ;;  %v302_v14 = vld [vmem:[%s1443_s1 + $0x30] sm:$0xff] }
  0x47   : > { %299 = vst [vmem:[#allocation3 + $0x20] sm:$0xff] %v298_v12  ;;  %301 = vst [vmem:[#allocation3 + $0x28] sm:$0xff] %v300_v13  ;;  %v304_v15 = vld [vmem:[%s1443_s1 + $0x38] sm:$0xff] }
  0x48   : > { %303 = vst [vmem:[#allocation3 + $0x30] sm:$0xff] %v302_v14  ;;  %305 = vst [vmem:[#allocation3 + $0x38] sm:$0xff] %v304_v15 }
  0x49   : > { %313 = vsyncadd [#allocation10], 1024 }
  0x4a   : > { %1119 = dma.done.wait [#allocation10], 1024 }
  0x4b   : > { %1120 = vsyncadd [#allocation10], 4294966272 }
  0x4c PF: > { %v326_v16 = vld [vmem:[#allocation3] sm:$0xff]  ;;  %v327_v17 = vld [vmem:[#allocation3 + $0x8] sm:$0xff]  ;;  %v1144_v18 = vmov 0   ;;  %v433_v22 = vld [vmem:[%s1444_s2 + $0x10] sm:$0xff]  ;;  %p877_p7 = scmp.ge.s32.totalorder %s1197_s22, 2 }
  0x4d   : > { %916 = vmatprep.subr.bf16.mxu0 %v326_v16  ;;  %1031 = vset.pattern.permute.xlu0 %v1144_v18  ;;  %v318_v19 = vld [vmem:[#allocation2] sm:$0xff]  ;;  %v328_v20 = vld [vmem:[#allocation3 + $0x10] sm:$0xff]  ;;  %v432_v23 = vld [vmem:[%s1444_s2 + $0x8] sm:$0xff] }
  0x4e   : > { %917 = vmatpush3.bf16.msra.mxu0 %v326_v16  ;;  %1032 = vset.pattern.permute.xlu1 %v1144_v18  ;;  %v431_v21 = vld [vmem:[%s1444_s2] sm:$0xff]  ;;  %v329_v24 = vld [vmem:[#allocation3 + $0x18] sm:$0xff]  ;;  %v436_v28 = vld [vmem:[%s1444_s2 + $0x28] sm:$0xff] }
  0x4f   : > { %918 = vmatprep.subr.bf16.mxu0 %v327_v17  ;;  %932 = vmatprep.mubr.bf16.mxu0 %v318_v19  ;;  %v434_v25 = vld [vmem:[%s1444_s2 + $0x18] sm:$0xff]  ;;  %v330_v26 = vld [vmem:[#allocation3 + $0x20] sm:$0xff]  ;;  %v437_v30 = vld [vmem:[%s1444_s2 + $0x30] sm:$0xff] }
  0x50   : > { %449 = vperm.xlu0 %1031, %v431_v21   ;;  %459 = vperm.xlu1 %1032, %v433_v22   ;;  %v435_v27 = vld [vmem:[%s1444_s2 + $0x20] sm:$0xff]  ;;  %v331_v31 = vld [vmem:[#allocation3 + $0x28] sm:$0xff]  ;;  %v438_v33 = vld [vmem:[%s1444_s2 + $0x38] sm:$0xff] }
  0x51   : > { %v1033_v29 = vld [vmem:[%s1264_s14] sm:$0xff]   ;;  %v1034_v32 = vld [vmem:[%s1264_s14 + $0x8] sm:$0xff]   ;;  %v1035_v34 = vld [vmem:[%s1264_s14 + $0x10] sm:$0xff]  }
  0x52   : > { %919 = vmatpush3.bf16.msra.mxu0 %v327_v17  ;;  %948 = vmatprep.subr.bf16.mxu1 %v1033_v29  ;;  %v439_v35 = vld [vmem:[%s1444_s2 + $0x40] sm:$0xff]  ;;  %v332_v36 = vld [vmem:[#allocation3 + $0x30] sm:$0xff]  ;;  %v440_v37 = vld [vmem:[%s1444_s2 + $0x48] sm:$0xff] }
  0x53   : > { %920 = vmatprep.subr.bf16.mxu0 %v328_v20  ;;  %949 = vmatpush3.bf16.msra.mxu1 %v1033_v29  ;;  %v1036_v38 = vld [vmem:[%s1264_s14 + $0x18] sm:$0xff]   ;;  %v441_v39 = vld [vmem:[%s1444_s2 + $0x50] sm:$0xff]  ;;  %v1037_v42 = vld [vmem:[%s1264_s14 + $0x20] sm:$0xff]  }
  0x54   : > { %454 = vperm.xlu0 %1031, %v432_v23   ;;  %464 = vperm.xlu1 %1032, %v434_v25   ;;  %v333_v40 = vld [vmem:[#allocation3 + $0x38] sm:$0xff]  ;;  %v443_v43 = vld [vmem:[%s1444_s2 + $0x60] sm:$0xff]  ;;  %v444_v44 = vld [vmem:[%s1444_s2 + $0x68] sm:$0xff] }
  0x55   : > { %950 = vmatprep.subr.bf16.mxu1 %v1034_v32  ;;  %v442_v41 = vld [vmem:[%s1444_s2 + $0x58] sm:$0xff]  ;;  %v319_v45 = vld [vmem:[#allocation2 + $0x8] sm:$0xff]  ;;  %v320_v47 = vld [vmem:[#allocation2 + $0x10] sm:$0xff] }
  0x56   : > { %921 = vmatpush3.bf16.msra.mxu0 %v328_v20  ;;  %v1038_v46 = vld [vmem:[%s1264_s14 + $0x28] sm:$0xff]   ;;  %v445_v48 = vld [vmem:[%s1444_s2 + $0x70] sm:$0xff]  ;;  %v446_v49 = vld [vmem:[%s1444_s2 + $0x78] sm:$0xff] }
  0x57   : > { %922 = vmatprep.subr.bf16.mxu0 %v329_v24  ;;  %951 = vmatpush3.bf16.msra.mxu1 %v1034_v32  ;;  %v321_v50 = vld [vmem:[#allocation2 + $0x18] sm:$0xff]  ;;  %v322_v51 = vld [vmem:[#allocation2 + $0x20] sm:$0xff]  ;;  %v323_v52 = vld [vmem:[#allocation2 + $0x28] sm:$0xff] }
  0x58   : > { %469 = vperm.xlu0 %1031, %v435_v27   ;;  %474 = vperm.xlu1 %1032, %v436_v28   ;;  %v324_v53 = vld [vmem:[#allocation2 + $0x30] sm:$0xff]  ;;  %v325_v54 = vld [vmem:[#allocation2 + $0x38] sm:$0xff] }
  0x59   : > { %952 = vmatprep.subr.bf16.mxu1 %v1035_v34  ;;  %v1039_v55 = vld [vmem:[%s1264_s14 + $0x30] sm:$0xff]   ;;  %v1040_v56 = vld [vmem:[%s1264_s14 + $0x38] sm:$0xff]  }
  0x5a   : > { %923 = vmatpush3.bf16.msra.mxu0 %v329_v24 }
  0x5b   : > { %924 = vmatprep.subr.bf16.mxu0 %v330_v26  ;;  %953 = vmatpush3.bf16.msra.mxu1 %v1035_v34 }
  0x5c   : > { %479 = vperm.xlu0 %1031, %v437_v30   ;;  %484 = vperm.xlu1 %1032, %v438_v33  }
  0x5d   : > { %954 = vmatprep.subr.bf16.mxu1 %v1036_v38 }
  0x5e   : > { %925 = vmatpush3.bf16.msra.mxu0 %v330_v26 }
  0x5f   : > { %926 = vmatprep.subr.bf16.mxu0 %v331_v31  ;;  %955 = vmatpush3.bf16.msra.mxu1 %v1036_v38 }
  0x60   : > { %489 = vperm.xlu0 %1031, %v439_v35   ;;  %494 = vperm.xlu1 %1032, %v440_v37  }
  0x61   : > { %956 = vmatprep.subr.bf16.mxu1 %v1037_v42 }
  0x62   : > { %927 = vmatpush3.bf16.msra.mxu0 %v331_v31 }
  0x63   : > { %928 = vmatprep.subr.bf16.mxu0 %v332_v36  ;;  %957 = vmatpush3.bf16.msra.mxu1 %v1037_v42 }
  0x64   : > { %499 = vperm.xlu0 %1031, %v441_v39   ;;  %504 = vperm.xlu1 %1032, %v442_v41  }
  0x65   : > { %958 = vmatprep.subr.bf16.mxu1 %v1038_v46 }
  0x66   : > { %929 = vmatpush3.bf16.msra.mxu0 %v332_v36 }
  0x67   : > { %930 = vmatprep.subr.bf16.mxu0 %v333_v40  ;;  %959 = vmatpush3.bf16.msra.mxu1 %v1038_v46 }
  0x68   : > { %509 = vperm.xlu0 %1031, %v443_v43   ;;  %514 = vperm.xlu1 %1032, %v444_v44  }
  0x69   : > { %960 = vmatprep.subr.bf16.mxu1 %v1039_v55 }
  0x6a   : > { %931 = vmatpush3.bf16.msra.mxu0 %v333_v40 }
  0x6b   : > { %961 = vmatpush3.bf16.msra.mxu1 %v1039_v55 }
  0x6c   : > { %519 = vperm.xlu0 %1031, %v445_v48   ;;  %524 = vperm.xlu1 %1032, %v446_v49   ;;  %v868_v49 = vld [vmem:[%s192_s11] ss:$0 sm:$0xff] }
  0x6d   : > { %933 = vmatmul.mubr.bf16.vlgmr.msra.gmra.mrb[0].mxu0 %v319_v45  ;;  %962 = vmatprep.subr.bf16.mxu1 %v1040_v56 }
  0x6e   : > { %936 = vmatprep.mubr.bf16.mxu0 %v320_v47 }
  0x6f   : > { %963 = vmatpush3.bf16.msra.mxu1 %v1040_v56 }
  0x75   : > { %937 = vmatmul.mubr.bf16.gmra.mrb[4].mxu0 %v321_v50 }
  0x76   : > { %940 = vmatprep.mubr.bf16.mxu0 %v322_v51 }
  0x7d   : > { %941 = vmatmul.mubr.bf16.gmra.mrb[8].mxu0 %v323_v52 }
  0x7e   : > { %944 = vmatprep.mubr.bf16.mxu0 %v324_v53 }
  0x85   : > { %945 = vmatmul.mubr.bf16.gmra.mrb[12].mxu0 %v325_v54 }
  0xcf   : > { %v450_v57 = vpop.permute.xlu0 %449  ;;  %v460_v58 = vpop.permute.xlu1 %459 }
  0xd3   : > { %v455_v59 = vpop.permute.xlu0 %454  ;;  %v465_v60 = vpop.permute.xlu1 %464 }
  0xd7   : > { %v470_v61 = vpop.permute.xlu0 %469  ;;  %v475_v62 = vpop.permute.xlu1 %474 }
  0xdb   : > { %v480_v0 = vpop.permute.xlu0 %479  ;;  %v485_v2 = vpop.permute.xlu1 %484 }
  0xdf   : > { %v490_v11 = vpop.permute.xlu0 %489  ;;  %v495_v12 = vpop.permute.xlu1 %494 }
  0xe3   : > { %v500_v21 = vpop.permute.xlu0 %499  ;;  %v505_v23 = vpop.permute.xlu1 %504 }
  0xe7   : > { %v510_v28 = vpop.permute.xlu0 %509  ;;  %v515_v32 = vpop.permute.xlu1 %514 }
  0xeb   : > { %v520_v38 = vpop.permute.xlu0 %519  ;;  %v525_v40 = vpop.permute.xlu1 %524 }
 0x140   : > { %v934_v63 = vpop.f32.mrb[0].mxu0 }
 0x141   : > { %v368_v1 = vpop.f32.mrb[1].mxu0  ;;  %v529_v4 = vmul.f32 %v934_v63, %v460_v58 }
 0x142   : > { %v935_v3 = vpop.f32.mrb[2].mxu0  ;;  %v527_v7 = vmul.f32 %v450_v57, %v368_v1 }
 0x143   : > { %v530_v5 = vmul.f32 %v935_v3, %v465_v60  ;;  %v371_v6 = vpop.f32.mrb[3].mxu0 }
 0x144   : > { %v528_v8 = vmul.f32 %v455_v59, %v371_v6 }
 0x145   : > { %v544_v9 = vpack.c.bf16 %v530_v5, %v529_v4 }
 0x146   : > { %v543_v10 = vpack.c.bf16 %v528_v8, %v527_v7 }
 0x148   : > { %v938_v13 = vpop.f32.mrb[4].mxu0  ;;  %964 = vmatprep.mubr.bf16.mxu1 %v543_v10 }
 0x149   : > { %v384_v14 = vpop.f32.mrb[5].mxu0  ;;  %965 = vmatmul.mubr.bf16.vlgmr.msra.gmra.mrb[0].mxu1 %v544_v9  ;;  %v533_v16 = vmul.f32 %v938_v13, %v480_v0 }
 0x14a   : > { %v939_v15 = vpop.f32.mrb[6].mxu0  ;;  %v531_v19 = vmul.f32 %v470_v61, %v384_v14 }
 0x14b   : > { %v534_v17 = vmul.f32 %v939_v15, %v485_v2  ;;  %v387_v18 = vpop.f32.mrb[7].mxu0 }
 0x14c   : > { %v532_v20 = vmul.f32 %v475_v62, %v387_v18 }
 0x14d   : > { %v546_v22 = vpack.c.bf16 %v534_v17, %v533_v16 }
 0x14e   : > { %v545_v24 = vpack.c.bf16 %v532_v20, %v531_v19 }
 0x150   : > { %v942_v25 = vpop.f32.mrb[8].mxu0  ;;  %968 = vmatprep.mubr.bf16.mxu1 %v545_v24 }
 0x151   : > { %v400_v26 = vpop.f32.mrb[9].mxu0  ;;  %969 = vmatmul.mubr.bf16.gmra.mrb[4].mxu1 %v546_v22  ;;  %v537_v29 = vmul.f32 %v942_v25, %v500_v21 }
 0x152   : > { %v943_v27 = vpop.f32.mrb[10].mxu0  ;;  %v535_v33 = vmul.f32 %v490_v11, %v400_v26 }
 0x153   : > { %v538_v30 = vmul.f32 %v943_v27, %v505_v23  ;;  %v403_v31 = vpop.f32.mrb[11].mxu0 }
 0x154   : > { %v536_v34 = vmul.f32 %v495_v12, %v403_v31 }
 0x155   : > { %v548_v35 = vpack.c.bf16 %v538_v30, %v537_v29 }
 0x156   : > { %v547_v36 = vpack.c.bf16 %v536_v34, %v535_v33 }
 0x158   : > { %v946_v37 = vpop.f32.mrb[12].mxu0  ;;  %972 = vmatprep.mubr.bf16.mxu1 %v547_v36 }
 0x159   : > { %v416_v39 = vpop.f32.mrb[13].mxu0  ;;  %973 = vmatmul.mubr.bf16.gmra.mrb[8].mxu1 %v548_v35  ;;  %v541_v42 = vmul.f32 %v946_v37, %v520_v38 }
 0x15a   : > { %v947_v41 = vpop.f32.mrb[14].mxu0  ;;  %v539_v45 = vmul.f32 %v510_v28, %v416_v39 }
 0x15b   : > { %v542_v43 = vmul.f32 %v947_v41, %v525_v40  ;;  %v419_v44 = vpop.f32.mrb[15].mxu0 }
 0x15c   : > { %v540_v46 = vmul.f32 %v515_v32, %v419_v44 }
 0x15d   : > { %v550_v47 = vpack.c.bf16 %v542_v43, %v541_v42 }
 0x15e   : > { %v549_v48 = vpack.c.bf16 %v540_v46, %v539_v45 }
 0x160   : > { %976 = vmatprep.mubr.bf16.mxu1 %v549_v48 }
 0x161   : > { %977 = vmatmul.mubr.bf16.gmra.mrb[12].mxu1 %v550_v47 }
 0x21c   : > { %v966_v50 = vpop.f32.mrb[0].mxu1 }
 0x21d   : > { %v1388_v51 = vadd.f32 %v966_v50, %v868_v49  ;;  %v656_v52 = vpop.f32.mrb[1].mxu1 }
 0x21e   : > { %v1390_v53 = vadd.f32 %v868_v49, %v656_v52  ;;  %v967_v54 = vpop.f32.mrb[2].mxu1 }
 0x21f   : > { %v1392_v55 = vadd.f32 %v967_v54, %v868_v49  ;;  %v659_v56 = vpop.f32.mrb[3].mxu1  ;;  %v725_v20 = vmax.f32 (!%p877_p7), %v1388_v51, 0.0 }
 0x220   : > { %v660_v57 = vadd.f32 %v868_v49, %v659_v56  ;;  %v723_v18 = vmax.f32 (!%p877_p7), %v1390_v53, 0.0 }
 0x221   : > { %v726_v21 = vmax.f32 (!%p877_p7), %v1392_v55, 0.0 }
 0x222   : > { %v724_v19 = vmax.f32 (!%p877_p7), %v660_v57, 0.0 }
 0x223   : > { %v740_v27 = vpack.c.bf16 (!%p877_p7), %v726_v21, %v725_v20 }
 0x224   : > { %v970_v58 = vpop.f32.mrb[4].mxu1  ;;  %v739_v26 = vpack.c.bf16 (!%p877_p7), %v724_v19, %v723_v18 }
 0x225   : > { %v1394_v59 = vadd.f32 %v970_v58, %v868_v49  ;;  %v672_v60 = vpop.f32.mrb[5].mxu1  ;;  %748 = vst [vmem:[#allocation3 + $0x8] sm:$0xff] (!%p877_p7), %v740_v27 }
 0x226   : > { %v673_v61 = vadd.f32 %v868_v49, %v672_v60  ;;  %v971_v62 = vpop.f32.mrb[6].mxu1  ;;  %747 = vst [vmem:[#allocation3] sm:$0xff] (!%p877_p7), %v739_v26 }
 0x227   : > { %v684_v63 = vadd.f32 %v971_v62, %v868_v49  ;;  %v675_v0 = vpop.f32.mrb[7].mxu1  ;;  %v729_v24 = vmax.f32 (!%p877_p7), %v1394_v59, 0.0 }
 0x228   : > { %v676_v1 = vadd.f32 %v868_v49, %v675_v0  ;;  %v727_v22 = vmax.f32 (!%p877_p7), %v673_v61, 0.0 }
 0x229   : > { %v730_v25 = vmax.f32 (!%p877_p7), %v684_v63, 0.0 }
 0x22a   : > { %v728_v23 = vmax.f32 (!%p877_p7), %v676_v1, 0.0 }
 0x22b   : > { %v742_v31 = vpack.c.bf16 (!%p877_p7), %v730_v25, %v729_v24 }
 0x22c   : > { %v974_v2 = vpop.f32.mrb[8].mxu1  ;;  %v741_v30 = vpack.c.bf16 (!%p877_p7), %v728_v23, %v727_v22 }
 0x22d   : > { %v697_v3 = vadd.f32 %v974_v2, %v868_v49  ;;  %v688_v4 = vpop.f32.mrb[9].mxu1  ;;  %750 = vst [vmem:[#allocation3 + $0x18] sm:$0xff] (!%p877_p7), %v742_v31 }
 0x22e   : > { %v689_v5 = vadd.f32 %v868_v49, %v688_v4  ;;  %v975_v6 = vpop.f32.mrb[10].mxu1  ;;  %749 = vst [vmem:[#allocation3 + $0x10] sm:$0xff] (!%p877_p7), %v741_v30 }
 0x22f   : > { %v700_v7 = vadd.f32 %v975_v6, %v868_v49  ;;  %v691_v8 = vpop.f32.mrb[11].mxu1  ;;  %v733_v32 = vmax.f32 (!%p877_p7), %v697_v3, 0.0 }
 0x230   : > { %v692_v9 = vadd.f32 %v868_v49, %v691_v8  ;;  %v731_v28 = vmax.f32 (!%p877_p7), %v689_v5, 0.0 }
 0x231   : > { %v734_v33 = vmax.f32 (!%p877_p7), %v700_v7, 0.0 }
 0x232   : > { %722 = sbr.rel (%p877_p7) target bundleno = 575 (0x23f), region = 114  ;;  %v732_v29 = vmax.f32 (!%p877_p7), %v692_v9, 0.0 }
 0x233   : > { %v744_v38 = vpack.c.bf16 (!%p877_p7), %v734_v33, %v733_v32 }
 0x234   : > { %v978_v10 = vpop.f32.mrb[12].mxu1  ;;  %v743_v34 = vpack.c.bf16 (!%p877_p7), %v732_v29, %v731_v28 }
 0x235   : > { %v713_v11 = vadd.f32 %v978_v10, %v868_v49  ;;  %v704_v12 = vpop.f32.mrb[13].mxu1  ;;  %752 = vst [vmem:[#allocation3 + $0x28] sm:$0xff] (!%p877_p7), %v744_v38 }
 0x236   : > { %v705_v13 = vadd.f32 %v868_v49, %v704_v12  ;;  %v979_v14 = vpop.f32.mrb[14].mxu1  ;;  %751 = vst [vmem:[#allocation3 + $0x20] sm:$0xff] (!%p877_p7), %v743_v34 }
 0x237   : > { %v716_v15 = vadd.f32 %v979_v14, %v868_v49  ;;  %v707_v16 = vpop.f32.mrb[15].mxu1  ;;  %v737_v37 = vmax.f32 (!%p877_p7), %v713_v11, 0.0 }
 0x238   : > { %v708_v17 = vadd.f32 %v868_v49, %v707_v16  ;;  %v735_v35 = vmax.f32 (!%p877_p7), %v705_v13, 0.0 }
 0x239   : > { %v738_v39 = vmax.f32 %v716_v15, 0.0 }
 0x23a   : > { %v736_v36 = vmax.f32 %v708_v17, 0.0 }
 0x23b   : > { %v746_v41 = vpack.c.bf16 %v738_v39, %v737_v37 }
 0x23c   : > { %v745_v40 = vpack.c.bf16 %v736_v36, %v735_v35 }
 0x23d   : > { %754 = vst [vmem:[#allocation3 + $0x38] sm:$0xff] %v746_v41 }
 0x23e   : > { %753 = vst [vmem:[#allocation3 + $0x30] sm:$0xff] %v745_v40 }
 0x23f PF: > { %p878_p4 = scmp.ne.s32.totalorder %s1197_s22, 2 }
 0x240   : > { %759 = vst [vmem:[#allocation7] sm:$0xff] (!%p878_p4), %v1390_v53  ;;  %760 = vst [vmem:[#allocation7 + $0x8] sm:$0xff] (!%p878_p4), %v660_v57 }
 0x241   : > { %758 = sbr.rel (%p878_p4) target bundleno = 584 (0x248), region = 118  ;;  %761 = vst [vmem:[#allocation7 + $0x10] sm:$0xff] (!%p878_p4), %v1388_v51  ;;  %762 = vst [vmem:[#allocation7 + $0x18] sm:$0xff] (!%p878_p4), %v1392_v55 }
 0x242   : > { %763 = vst [vmem:[#allocation7 + $0x20] sm:$0xff] (!%p878_p4), %v673_v61  ;;  %764 = vst [vmem:[#allocation7 + $0x28] sm:$0xff] (!%p878_p4), %v676_v1 }
 0x243   : > { %765 = vst [vmem:[#allocation7 + $0x30] sm:$0xff] (!%p878_p4), %v1394_v59  ;;  %766 = vst [vmem:[#allocation7 + $0x38] sm:$0xff] (!%p878_p4), %v684_v63 }
 0x244   : > { %767 = vst [vmem:[#allocation7 + $0x40] sm:$0xff] (!%p878_p4), %v689_v5  ;;  %768 = vst [vmem:[#allocation7 + $0x48] sm:$0xff] (!%p878_p4), %v692_v9 }
 0x245   : > { %769 = vst [vmem:[#allocation7 + $0x50] sm:$0xff] (!%p878_p4), %v697_v3  ;;  %770 = vst [vmem:[#allocation7 + $0x58] sm:$0xff] (!%p878_p4), %v700_v7 }
 0x246   : > { %771 = vst [vmem:[#allocation7 + $0x60] sm:$0xff] (!%p878_p4), %v705_v13  ;;  %772 = vst [vmem:[#allocation7 + $0x68] sm:$0xff] (!%p878_p4), %v708_v17 }
 0x247   : > { %773 = vst [vmem:[#allocation7 + $0x70] sm:$0xff] (!%p878_p4), %v713_v11  ;;  %774 = vst [vmem:[#allocation7 + $0x78] sm:$0xff] (!%p878_p4), %v716_v15 }
 0x248 PF: > { %p991_p5 = scmp.eq.s32.totalorder %s1197_s22, 2  ;;  %s1145_s8 = smov [#allocation7]  }
 0x249   : > { %s781_s11 = sshll.u32 %s1145_s8, 4  ;;  %s782_s11 = int_to_ptr.vmem [resolvable:$true] %s781_s11 }
 0x24a   : > { %s1071_s13 = scalar_lea.vmem %s782_s11, 2048  ;;  %p1078_p0 = scmp.lt.s32.totalorder %s782_s11, %s782_s11 }
 0x24b   : > { %p1072_p6 = scmp.ne.s32.totalorder %s782_s11, %s1071_s13  ;;  %p1079_p1 = scmp.lt.s32.totalorder %s1071_s13, %s1071_s13 }
 0x24d   : > { %p1073_p10 = pnand %p1072_p6, %p991_p5  ;;  %p1080_p2 = por %p1079_p1, %p1078_p0 }
 0x24f   : > { %p1074_p12 = pneg %p1073_p10 }
 0x251   : > { %p1081_p11 = pnand %p1080_p2, %p1074_p12 }
 0x253   : > { %1084 = shalt.err (!%p1081_p11)
}
 0x254   : > { %s1085_s12 = scalar_lea.hbm %s1447_s5, 2048 }
 0x255   : > { %p1086_p13 = scmp.ne.s32.totalorder %s1447_s5, %s1085_s12  ;;  %p1091_p8 = scmp.lt.u32.totalorder %s1085_s12, %s1447_s5 }
 0x257   : > { %p1087_p3 = pnand %p1086_p13, %p991_p5 }
 0x259   : > { %p1088_p9 = pneg %p1087_p3 }
 0x25b   : > { %p1093_p7 = pnand %p1091_p8, %p1088_p9 }
 0x25d   : > { %1096 = shalt.err (!%p1093_p7)
}
 0x25e   : > { %s1146_s18 = smov 128   ;;  %s1147_s24 = smov 8  }
 0x25f   : > { %983 = dma.vmem_to_hbm [thread:$0]  (%p991_p5), %s782_s11, 2048, %s1447_s5, [#allocation6], %s1146_s18, %s1146_s18, %s1147_s24  }
 0x260   : > { %1122 = dma.done.wait (%p991_p5), [#allocation6], 2048  }
 0x261   : > { %1124 = vsyncadd (%p991_p5), [#allocation6], 4294965248 }
 0x262 PF: > { %p16_p4 = scmp.ge.s32.totalorder %s1200_s23, 5   ;;  %s1451_s18 = smov %s1131_s19 }
 0x263   : > { %s1452_s19 = smov %s1135_s20  ;;  %s1453_s20 = smov %s1210_s26 }
 0x264   : > { %s1454_s21 = smov %s1200_s23  ;;  %18 = sbr.rel (!%p16_p4) target bundleno = 4 (0x4), region = 170 }
 0x26b   :  { %797 = vsyncpa [#allocation5], 1 }
 0x26c   :  { %799 = vsyncpa [#allocation5 + $0x1], 1 }
 0x26d   :  { %800 = vsyncpa [#allocation6], 1 }
 0x26e   :  { %802 = vsyncpa [#allocation6 + $0x1], 1 }

</bundles_post_ra>
